<compile_context>
chip_gen: v5e
topology: v5e:2x2
jax: 0.10.0
libtpu: 0.0.40
codegen_flags: <defaults>
</compile_context>

<pallas_src>
import jax
import jax.numpy as jnp
from jax.experimental import pallas as pl
from jax.experimental.pallas import tpu as pltpu

TILE_B = 128  # batch rows per grid step; fills the 128-lane MXU/VPU axis


def mlp_kernel(x_ref, w1_ref, b1_ref, w2_ref, b2_ref, o_ref):
    """sigmoid(relu(x @ W1^T + b1) @ W2^T + b2) for one batch tile.

    Shapes:
      x_ref : (TILE_B, F)  batch tile (streamed per grid step)
      w1_ref: (H, F)       fc1 weight (PyTorch layout), VMEM-resident
      b1_ref: (H, 1)       fc1 bias column, VMEM-resident
      w2_ref: (H, 1)       fc2 weight column, VMEM-resident
      b2_ref: (1, 1)       fc2 bias scalar, SMEM
      o_ref : (1, TILE_B)  lane-dense output row (batch on the lane axis)
    """
    # fc1 on the MXU: contract F of (H, F) with F of (TILE_B, F) -> (H, TILE_B).
    h = jax.lax.dot_general(
        w1_ref[...], x_ref[...],
        dimension_numbers=(((1,), (1,)), ((), ())),
        preferred_element_type=jnp.float32,
    )
    # bias + ReLU on the VPU (bias broadcasts along the lane/batch axis).
    h = jnp.maximum(h + b1_ref[...], 0.0)
    # Dropout (eval mode) -> identity.
    # TODO(synk): training-mode dropout would use pltpu.prng_seed + pltpu.prng_random_bits.
    # fc2 as broadcast-mul + sublane reduce (avoids a second, N=1 MXU pass).
    logits = jnp.sum(h * w2_ref[...], axis=0, keepdims=True) + b2_ref[0, 0]
    # Sigmoid: exp goes to the EUP slot.
    o_ref[...] = jax.nn.sigmoid(logits)


@jax.jit
def neural_network_forward(x, fc1_w, fc1_b, fc2_w, fc2_b):
    """Forward pass matching the PyTorch module (eval mode).

    Parameters use PyTorch nn.Linear layout:
      fc1_w: (H, F), fc1_b: (H,), fc2_w: (1, H), fc2_b: (1,)
    x: (B, F) float32 -> returns (B, 1) float32.
    """
    B, F = x.shape
    H = fc1_w.shape[0]

    num_tiles = pl.cdiv(B, TILE_B)
    b_pad = num_tiles * TILE_B
    x = x.astype(jnp.float32)
    if b_pad != B:
        x = jnp.pad(x, ((0, b_pad - B), (0, 0)))

    w1 = fc1_w.astype(jnp.float32)                    # (H, F)
    b1_col = fc1_b.reshape(H, 1).astype(jnp.float32)  # (H, 1)
    w2_col = fc2_w.reshape(H, 1).astype(jnp.float32)  # (H, 1)
    b2_s = fc2_b.reshape(1, 1).astype(jnp.float32)    # (1, 1) -> SMEM scalar

    cost = pl.CostEstimate(
        flops=2 * b_pad * H * (F + 2),
        transcendentals=b_pad,
        bytes_accessed=4 * (b_pad * F + b_pad + H * F + 2 * H + 1),
    )

    out_row = pl.pallas_call(
        mlp_kernel,
        out_shape=jax.ShapeDtypeStruct((1, b_pad), jnp.float32),
        grid=(num_tiles,),
        in_specs=[
            # x: one (TILE_B, F) tile per grid step (double-buffered from HBM).
            pl.BlockSpec((TILE_B, F), lambda i: (i, 0)),
            # Weights/biases: full blocks with a constant index -> fetched once,
            # stay resident in VMEM across all grid steps.
            pl.BlockSpec((H, F), lambda i: (0, 0)),
            pl.BlockSpec((H, 1), lambda i: (0, 0)),
            pl.BlockSpec((H, 1), lambda i: (0, 0)),
            # fc2 bias scalar lives in SMEM (no VMEM tile / vreg broadcast).
            pl.BlockSpec(memory_space=pltpu.SMEM),
        ],
        # Lane-dense output: per-step (1, TILE_B) chunk of a single (1, B_pad) row.
        out_specs=pl.BlockSpec((1, TILE_B), lambda i: (0, i)),
        compiler_params=pltpu.CompilerParams(
            dimension_semantics=("parallel",),
        ),
        cost_estimate=cost,
    )(x, w1, b1_col, w2_col, b2_s)

    # Layout plumbing back to the PyTorch (B, 1) column output.
    return out_row.reshape(b_pad, 1)[:B]


if __name__ == "__main__":
    # input_size=32, hidden_size=32; B=300 exercises multiple grid tiles + padding.
    B, F, H = 300, 32, 32

    key = jax.random.PRNGKey(0)
    kx, kw1, kb1, kw2, kb2 = jax.random.split(key, 5)

    bound1 = 1.0 / F ** 0.5
    bound2 = 1.0 / H ** 0.5
    x = jax.random.normal(kx, (B, F), dtype=jnp.float32)
    fc1_w = jax.random.uniform(kw1, (H, F), jnp.float32, -bound1, bound1)
    fc1_b = jax.random.uniform(kb1, (H,), jnp.float32, -bound1, bound1)
    fc2_w = jax.random.uniform(kw2, (1, H), jnp.float32, -bound2, bound2)
    fc2_b = jax.random.uniform(kb2, (1,), jnp.float32, -bound2, bound2)

    out = neural_network_forward(x, fc1_w, fc1_b, fc2_w, fc2_b)
    jax.block_until_ready(out)

    # Reference in plain JAX (PyTorch semantics, eval-mode dropout).
    ref = jax.nn.sigmoid(jnp.maximum(x @ fc1_w.T + fc1_b, 0.0) @ fc2_w.T + fc2_b)
    assert out.shape == (B, 1), out.shape
    assert jnp.allclose(out, ref, atol=1e-5), float(jnp.max(jnp.abs(out - ref)))

    print("KERNEL_OK")
</pallas_src>

<mosaic_0001>
module attributes {stable_mosaic.version = 11 : i64} {
  func.func @mlp_kernel(%arg0: i32, %arg1: memref<128x32xf32, #tpu.memory_space<vmem>>, %arg2: memref<32x32xf32, #tpu.memory_space<vmem>>, %arg3: memref<32x1xf32, #tpu.memory_space<vmem>>, %arg4: memref<32x1xf32, #tpu.memory_space<vmem>>, %arg5: memref<1x1xf32, #tpu.memory_space<smem>>, %arg6: memref<1x128xf32, #tpu.memory_space<vmem>>) attributes {dimension_semantics = [#tpu.dimension_semantics<parallel>], iteration_bounds = array<i64: 3>, scalar_prefetch = 0 : i64, scratch_operands = 0 : i64, tpu.core_type = #tpu.core_type<tc>, window_params = [{transform_indices = @transform_0, window_bounds = array<i64: 128, 32>}, {pipeline_mode = #tpu.pipeline_mode<synchronous>, transform_indices = @transform_1, window_bounds = array<i64: 32, 32>}, {pipeline_mode = #tpu.pipeline_mode<synchronous>, transform_indices = @transform_2, window_bounds = array<i64: 32, 1>}, {pipeline_mode = #tpu.pipeline_mode<synchronous>, transform_indices = @transform_3, window_bounds = array<i64: 32, 1>}, {transform_indices = @transform_4, window_bounds = array<i64: 1, 1>}, {transform_indices = @transform_5, window_bounds = array<i64: 1, 128>}]} {
    %c0 = arith.constant 0 : index
    %c0_0 = arith.constant 0 : index
    %0 = vector.load %arg2[%c0, %c0_0] : memref<32x32xf32, #tpu.memory_space<vmem>>, vector<32x32xf32>
    %c0_1 = arith.constant 0 : index
    %c0_2 = arith.constant 0 : index
    %1 = vector.load %arg1[%c0_1, %c0_2] : memref<128x32xf32, #tpu.memory_space<vmem>>, vector<128x32xf32>
    %cst = arith.constant dense<0.000000e+00> : vector<32x128xf32>
    %2 = tpu.matmul %0, %1, %cst {dimension_numbers = #tpu.dot_dimension_numbers<[1], [1], [0], [0], [0, 0, 1, 0], [], []>} : vector<32x32xf32>, vector<128x32xf32>, vector<32x128xf32> -> vector<32x128xf32>
    %c0_3 = arith.constant 0 : index
    %c0_4 = arith.constant 0 : index
    %3 = vector.load %arg3[%c0_3, %c0_4] : memref<32x1xf32, #tpu.memory_space<vmem>>, vector<32x1xf32>
    %4 = vector.broadcast %3 : vector<32x1xf32> to vector<32x128xf32>
    %5 = arith.addf %2, %4 : vector<32x128xf32>
    %cst_5 = arith.constant 0.000000e+00 : f32
    %6 = vector.broadcast %cst_5 : f32 to vector<32x128xf32>
    %7 = arith.maximumf %5, %6 : vector<32x128xf32>
    %c0_6 = arith.constant 0 : index
    %c0_7 = arith.constant 0 : index
    %8 = vector.load %arg4[%c0_6, %c0_7] : memref<32x1xf32, #tpu.memory_space<vmem>>, vector<32x1xf32>
    %9 = vector.broadcast %8 : vector<32x1xf32> to vector<32x128xf32>
    %10 = arith.mulf %7, %9 : vector<32x128xf32>
    %cst_8 = arith.constant dense<0.000000e+00> : vector<128xf32>
    %11 = vector.multi_reduction <add>, %10, %cst_8 [0] : vector<32x128xf32> to vector<128xf32>
    %12 = vector.shape_cast %11 : vector<128xf32> to vector<1x128xf32>
    %c0_9 = arith.constant 0 : index
    %c0_10 = arith.constant 0 : index
    %13 = memref.load %arg5[%c0_9, %c0_10] : memref<1x1xf32, #tpu.memory_space<smem>>
    %14 = vector.broadcast %13 : f32 to vector<1x128xf32>
    %15 = arith.addf %12, %14 : vector<1x128xf32>
    %16 = arith.negf %15 : vector<1x128xf32>
    %17 = math.exp %16 : vector<1x128xf32>
    %cst_11 = arith.constant 1.000000e+00 : f32
    %18 = vector.broadcast %cst_11 : f32 to vector<1x128xf32>
    %19 = arith.addf %18, %17 : vector<1x128xf32>
    %20 = arith.divf %18, %19 : vector<1x128xf32>
    %c0_12 = arith.constant 0 : index
    %c0_13 = arith.constant 0 : index
    %21 = vector.load %arg6[%c0_12, %c0_13] : memref<1x128xf32, #tpu.memory_space<vmem>>, vector<1x128xf32>
    tpu.vector_store %arg6[%c0_12, %c0_13], %20 {strides = array<i32>} : memref<1x128xf32, #tpu.memory_space<vmem>>, vector<1x128xf32>,
    return
  }
  func.func @transform_0(%arg0: i32) -> (i32, i32) {
    %c0_i32 = arith.constant 0 : i32
    %c0_i32_0 = arith.constant 0 : i32
    return %arg0, %c0_i32 : i32, i32
  }
  func.func @transform_1(%arg0: i32) -> (i32, i32) {
    %c0_i32 = arith.constant 0 : i32
    %c0_i32_0 = arith.constant 0 : i32
    %c0_i32_1 = arith.constant 0 : i32
    return %c0_i32, %c0_i32_0 : i32, i32
  }
  func.func @transform_2(%arg0: i32) -> (i32, i32) {
    %c0_i32 = arith.constant 0 : i32
    %c0_i32_0 = arith.constant 0 : i32
    %c0_i32_1 = arith.constant 0 : i32
    return %c0_i32, %c0_i32_0 : i32, i32
  }
  func.func @transform_3(%arg0: i32) -> (i32, i32) {
    %c0_i32 = arith.constant 0 : i32
    %c0_i32_0 = arith.constant 0 : i32
    %c0_i32_1 = arith.constant 0 : i32
    return %c0_i32, %c0_i32_0 : i32, i32
  }
  func.func @transform_4(%arg0: i32) -> (i32, i32) {
    %c0_i32 = arith.constant 0 : i32
    %c0_i32_0 = arith.constant 0 : i32
    %c0_i32_1 = arith.constant 0 : i32
    return %c0_i32, %c0_i32_0 : i32, i32
  }
  func.func @transform_5(%arg0: i32) -> (i32, i32) {
    %c0_i32 = arith.constant 0 : i32
    %c0_i32_0 = arith.constant 0 : i32
    return %c0_i32, %arg0 : i32, i32
  }
}

</mosaic_0001>

<bundles_post_ra>
// kernel: neural_network_forward.1
= control target key start
LH: loop header
LB: loop body
LE: loop exit
PB: predicated region body
PF: predicated region fallthrough
CT: control target
= control target key end

     0   :  { %s605_s20 = smov 0   ;;  %s749_s0 = inlined_call_operand.vmem [shape: f32[384,32], index: 0, kind: input, shape index: {}]   ;;  %s750_s1 = inlined_call_operand.vmem [shape: f32[32,32], index: 1, kind: input, shape index: {}]   ;;  %s751_s2 = inlined_call_operand.vmem [shape: f32[32,1], index: 2, kind: input, shape index: {}]   ;;  %s752_s3 = inlined_call_operand.vmem [shape: f32[32,1], index: 3, kind: input, shape index: {}]   ;;  %s753_s4 = inlined_call_operand.<no memory space> [shape: f32[1,1], index: 4, kind: input, shape index: {}]   ;;  %s754_s5 = inlined_call_operand.vmem [shape: f32[1,384], index: 5, kind: output, shape index: {}]  }
   0x1   :  { %10 = sst [smem:[#allocation2]] %s753_s4 }
   0x2 LB: > { %s611_s21 = sadd.s32 4294967295, %s569_s20   ;;  %p473_p0 = scmp.ge.s32.totalorder %s569_s20, 1  ;;  %s569_s20 = sphi %s605_s20, %s16_s20  }
   0x3   : > { %p189_p1 = scmp.lt.s32.totalorder %s569_s20, 4 }
   0x5   : > { %p190_p2 = pnand %p473_p0, %p189_p1 }
   0x6   : > { %s474_s22 = sshll.u32 (!%p190_p2), %s611_s21, 4  ;;  %s399_s26 = sld [smem:[#allocation2]] (!%p190_p2) }
   0x7   : > { %193 = sbr.rel (%p190_p2) target bundleno = 265 (0x109), region = 40  ;;  %p216_p3 = scmp.lt.s32.totalorder (!%p190_p2), %s474_s22, 47 }
   0x8   : > { %p221_p4 = scmp.lt.s32.totalorder (!%p190_p2), %s611_s21, 2 }
   0xc   : > { %s756_s22 = smov (!%p216_p3, %s474_s22), 47  ;;  %vm268_vm0 = vcmask 261120   ;;  %v244_v6 = vld [vmem:[%s751_s2] sm:$0xff]  ;;  %v571_v7 = vmov 0   ;;  %v246_v9 = vld [vmem:[%s751_s2 + $0x10] sm:$0xff]  ;;  %v245_v11 = vld [vmem:[%s751_s2 + $0x8] sm:$0xff]  ;;  %v400_v61 = vstv %s399_s26 }
   0xd   : > { %s475_s4 = sshll.u32 %s756_s22, 3  ;;  %556 = vset.pattern.permute.xlu0 %v571_v7  ;;  %557 = vset.pattern.permute.xlu1 %v571_v7  ;;  %v247_v13 = vld [vmem:[%s751_s2 + $0x18] sm:$0xff]  ;;  %v364_v14 = vld [vmem:[%s752_s3 + $0x10] sm:$0xff]  ;;  %v362_v15 = vld [vmem:[%s752_s3] sm:$0xff]  ;;  %s758_s21 = smov (!%p221_p4, %s611_s21), 2 }
   0xe   : > { %s619_s25 = scalar_lea.vmem %s749_s0, %s475_s4  ;;  %250 = vperm.xlu0 %556, %v244_v6   ;;  %558 = vset.pattern.permute.xlu2 %v571_v7  ;;  %v365_v17 = vld [vmem:[%s752_s3 + $0x18] sm:$0xff]  ;;  %v363_v19 = vld [vmem:[%s752_s3 + $0x8] sm:$0xff]  ;;  %v224_v25 = vld [vmem:[%s750_s1] sm:$0xff]  ;;  %s223_s29 = scalar_lea.vmem %s754_s5, %s758_s21 }
   0xf   : > { %v243_v0 = vld [vmem:[%s619_s25 + $0x78] sm:$0xff]  ;;  %v242_v1 = vld [vmem:[%s619_s25 + $0x70] sm:$0xff]  ;;  %v241_v2 = vld [vmem:[%s619_s25 + $0x68] sm:$0xff]  ;;  %260 = vperm.xlu1 %557, %v246_v9   ;;  %368 = vperm.xlu2 %558, %v362_v15  }
  0x10   : > { %476 = vmatpush.xpose.msk.msra.mxu0 %vm268_vm0, %v243_v0  ;;  %499 = vmatpush.xpose.msk.msra.mxu1 %vm268_vm0, %v243_v0  ;;  %v240_v3 = vld [vmem:[%s619_s25 + $0x60] sm:$0xff]  ;;  %v239_v4 = vld [vmem:[%s619_s25 + $0x58] sm:$0xff]  ;;  %v238_v5 = vld [vmem:[%s619_s25 + $0x50] sm:$0xff] }
  0x11   : > { %500 = vmatpush.xpose.msk.msra.mxu2 %vm268_vm0, %v243_v0  ;;  %501 = vmatpush.xpose.msk.msra.mxu3 %vm268_vm0, %v243_v0  ;;  %v237_v8 = vld [vmem:[%s619_s25 + $0x48] sm:$0xff]  ;;  %v236_v10 = vld [vmem:[%s619_s25 + $0x40] sm:$0xff]  ;;  %v235_v12 = vld [vmem:[%s619_s25 + $0x38] sm:$0xff] }
  0x12   : > { %v234_v16 = vld [vmem:[%s619_s25 + $0x30] sm:$0xff]  ;;  %v233_v18 = vld [vmem:[%s619_s25 + $0x28] sm:$0xff]  ;;  %v232_v20 = vld [vmem:[%s619_s25 + $0x20] sm:$0xff] }
  0x13   : > { %v231_v21 = vld [vmem:[%s619_s25 + $0x18] sm:$0xff]  ;;  %v230_v22 = vld [vmem:[%s619_s25 + $0x10] sm:$0xff]  ;;  %v229_v23 = vld [vmem:[%s619_s25 + $0x8] sm:$0xff] }
  0x14   : > { %477 = vmatpush.xpose.msk.msra.mxu0 %vm268_vm0, %v242_v1  ;;  %502 = vmatpush.xpose.msk.msra.mxu1 %vm268_vm0, %v242_v1  ;;  %v228_v24 = vld [vmem:[%s619_s25] sm:$0xff]  ;;  %v225_v26 = vld [vmem:[%s750_s1 + $0x8] sm:$0xff]  ;;  %v226_v27 = vld [vmem:[%s750_s1 + $0x10] sm:$0xff] }
  0x15   : > { %503 = vmatpush.xpose.msk.msra.mxu2 %vm268_vm0, %v242_v1  ;;  %504 = vmatpush.xpose.msk.msra.mxu3 %vm268_vm0, %v242_v1  ;;  %v227_v28 = vld [vmem:[%s750_s1 + $0x18] sm:$0xff] }
  0x16   : > { %255 = vperm.xlu0 %556, %v245_v11  }
  0x17   : > { %265 = vperm.xlu1 %557, %v247_v13   ;;  %373 = vperm.xlu2 %558, %v363_v19  }
  0x18   : > { %478 = vmatpush.xpose.msk.msra.mxu0 %vm268_vm0, %v241_v2  ;;  %505 = vmatpush.xpose.msk.msra.mxu1 %vm268_vm0, %v241_v2 }
  0x19   : > { %506 = vmatpush.xpose.msk.msra.mxu2 %vm268_vm0, %v241_v2  ;;  %507 = vmatpush.xpose.msk.msra.mxu3 %vm268_vm0, %v241_v2 }
  0x1c   : > { %479 = vmatpush.xpose.msk.msra.mxu0 %vm268_vm0, %v240_v3  ;;  %508 = vmatpush.xpose.msk.msra.mxu1 %vm268_vm0, %v240_v3 }
  0x1d   : > { %509 = vmatpush.xpose.msk.msra.mxu2 %vm268_vm0, %v240_v3  ;;  %510 = vmatpush.xpose.msk.msra.mxu3 %vm268_vm0, %v240_v3 }
  0x1e   : > { %378 = vperm.xlu0 %556, %v364_v14  }
  0x1f   : > { %383 = vperm.xlu1 %557, %v365_v17  }
  0x20   : > { %480 = vmatpush.xpose.msk.msra.mxu0 %vm268_vm0, %v239_v4  ;;  %511 = vmatpush.xpose.msk.msra.mxu1 %vm268_vm0, %v239_v4 }
  0x21   : > { %512 = vmatpush.xpose.msk.msra.mxu2 %vm268_vm0, %v239_v4  ;;  %513 = vmatpush.xpose.msk.msra.mxu3 %vm268_vm0, %v239_v4 }
  0x24   : > { %481 = vmatpush.xpose.msk.msra.mxu0 %vm268_vm0, %v238_v5  ;;  %514 = vmatpush.xpose.msk.msra.mxu1 %vm268_vm0, %v238_v5 }
  0x25   : > { %515 = vmatpush.xpose.msk.msra.mxu2 %vm268_vm0, %v238_v5  ;;  %516 = vmatpush.xpose.msk.msra.mxu3 %vm268_vm0, %v238_v5 }
  0x28   : > { %482 = vmatpush.xpose.msk.msra.mxu0 %vm268_vm0, %v237_v8  ;;  %517 = vmatpush.xpose.msk.msra.mxu1 %vm268_vm0, %v237_v8 }
  0x29   : > { %518 = vmatpush.xpose.msk.msra.mxu2 %vm268_vm0, %v237_v8  ;;  %519 = vmatpush.xpose.msk.msra.mxu3 %vm268_vm0, %v237_v8 }
  0x2c   : > { %483 = vmatpush.xpose.msk.msra.mxu0 %vm268_vm0, %v236_v10  ;;  %520 = vmatpush.xpose.msk.msra.mxu1 %vm268_vm0, %v236_v10 }
  0x2d   : > { %521 = vmatpush.xpose.msk.msra.mxu2 %vm268_vm0, %v236_v10  ;;  %522 = vmatpush.xpose.msk.msra.mxu3 %vm268_vm0, %v236_v10 }
  0x30   : > { %484 = vmatpush.xpose.msk.msra.mxu0 %vm268_vm0, %v235_v12  ;;  %523 = vmatpush.xpose.msk.msra.mxu1 %vm268_vm0, %v235_v12 }
  0x31   : > { %524 = vmatpush.xpose.msk.msra.mxu2 %vm268_vm0, %v235_v12  ;;  %525 = vmatpush.xpose.msk.msra.mxu3 %vm268_vm0, %v235_v12 }
  0x34   : > { %485 = vmatpush.xpose.msk.msra.mxu0 %vm268_vm0, %v234_v16  ;;  %526 = vmatpush.xpose.msk.msra.mxu1 %vm268_vm0, %v234_v16 }
  0x35   : > { %527 = vmatpush.xpose.msk.msra.mxu2 %vm268_vm0, %v234_v16  ;;  %528 = vmatpush.xpose.msk.msra.mxu3 %vm268_vm0, %v234_v16 }
  0x38   : > { %486 = vmatpush.xpose.msk.msra.mxu0 %vm268_vm0, %v233_v18  ;;  %529 = vmatpush.xpose.msk.msra.mxu1 %vm268_vm0, %v233_v18 }
  0x39   : > { %530 = vmatpush.xpose.msk.msra.mxu2 %vm268_vm0, %v233_v18  ;;  %531 = vmatpush.xpose.msk.msra.mxu3 %vm268_vm0, %v233_v18 }
  0x3c   : > { %487 = vmatpush.xpose.msk.msra.mxu0 %vm268_vm0, %v232_v20  ;;  %532 = vmatpush.xpose.msk.msra.mxu1 %vm268_vm0, %v232_v20 }
  0x3d   : > { %533 = vmatpush.xpose.msk.msra.mxu2 %vm268_vm0, %v232_v20  ;;  %534 = vmatpush.xpose.msk.msra.mxu3 %vm268_vm0, %v232_v20 }
  0x40   : > { %488 = vmatpush.xpose.msk.msra.mxu0 %vm268_vm0, %v231_v21  ;;  %535 = vmatpush.xpose.msk.msra.mxu1 %vm268_vm0, %v231_v21 }
  0x41   : > { %536 = vmatpush.xpose.msk.msra.mxu2 %vm268_vm0, %v231_v21  ;;  %537 = vmatpush.xpose.msk.msra.mxu3 %vm268_vm0, %v231_v21 }
  0x44   : > { %489 = vmatpush.xpose.msk.msra.mxu0 %vm268_vm0, %v230_v22  ;;  %538 = vmatpush.xpose.msk.msra.mxu1 %vm268_vm0, %v230_v22 }
  0x45   : > { %539 = vmatpush.xpose.msk.msra.mxu2 %vm268_vm0, %v230_v22  ;;  %540 = vmatpush.xpose.msk.msra.mxu3 %vm268_vm0, %v230_v22 }
  0x48   : > { %490 = vmatpush.xpose.msk.msra.mxu0 %vm268_vm0, %v229_v23  ;;  %541 = vmatpush.xpose.msk.msra.mxu1 %vm268_vm0, %v229_v23 }
  0x49   : > { %542 = vmatpush.xpose.msk.msra.mxu2 %vm268_vm0, %v229_v23  ;;  %543 = vmatpush.xpose.msk.msra.mxu3 %vm268_vm0, %v229_v23 }
  0x4c   : > { %491 = vmatpush.xpose.msk.msra.mxu0 %vm268_vm0, %v228_v24  ;;  %544 = vmatpush.xpose.msk.msra.mxu1 %vm268_vm0, %v228_v24 }
  0x4d   : > { %545 = vmatpush.xpose.msk.msra.mxu2 %vm268_vm0, %v228_v24  ;;  %546 = vmatpush.xpose.msk.msra.mxu3 %vm268_vm0, %v228_v24 }
  0x4f   : > { %492 = vmatmul.msk.f32.vlgmr.msra.gmra.mxu0 %vm268_vm0, %v224_v25  ;;  %493 = vmatmul.msk.f32.vlgmr.msra.gmra.mxu1 %vm268_vm0, %v225_v26 }
  0x50   : > { %494 = vmatmul.msk.f32.vlgmr.msra.gmra.mxu2 %vm268_vm0, %v226_v27  ;;  %495 = vmatmul.msk.f32.vlgmr.msra.gmra.mxu3 %vm268_vm0, %v227_v28 }
  0x69   : > { %v369_v31 = vpop.permute.xlu2 %368 }
  0x71   : > { %v374_v40 = vpop.permute.xlu2 %373 }
  0x80   : > { %v251_v29 = vpop.permute.xlu0 %250 }
  0x81   : > { %v261_v30 = vpop.permute.xlu1 %260 }
  0x88   : > { %v256_v32 = vpop.permute.xlu0 %255 }
  0x89   : > { %v266_v37 = vpop.permute.xlu1 %265 }
  0x90   : > { %v379_v49 = vpop.permute.xlu0 %378 }
  0x91   : > { %v384_v52 = vpop.permute.xlu1 %383 }
  0xcc   : > { %v346_v33 = vpop.f32.mrf.mxu0  ;;  %v349_v34 = vpop.f32.mrf.mxu1 }
  0xcd   : > { %v347_v35 = vadd.f32 %v346_v33, %v251_v29  ;;  %v350_v36 = vadd.f32 %v349_v34, %v256_v32 }
  0xcf   : > { %v358_v38 = vmax.f32 %v347_v35, 0.0  ;;  %v359_v39 = vmax.f32 %v350_v36, 0.0 }
  0xd1   : > { %v386_v43 = vmul.f32 %v369_v31, %v358_v38  ;;  %v387_v44 = vmul.f32 %v374_v40, %v359_v39 }
  0xd3   : > { %v352_v41 = vpop.f32.mrf.mxu2  ;;  %v355_v42 = vpop.f32.mrf.mxu3  ;;  %v390_v50 = vadd.f32 %v387_v44, %v386_v43 }
  0xd4   : > { %v353_v45 = vadd.f32 %v352_v41, %v261_v30  ;;  %v356_v46 = vadd.f32 %v355_v42, %v266_v37 }
  0xd6   : > { %v360_v47 = vmax.f32 %v353_v45, 0.0  ;;  %v361_v48 = vmax.f32 %v356_v46, 0.0 }
  0xd8   : > { %v388_v51 = vmul.f32 %v379_v49, %v360_v47  ;;  %v389_v54 = vmul.f32 %v384_v52, %v361_v48 }
  0xda   : > { %v391_v53 = vadd.f32 %v390_v50, %v388_v51 }
  0xdc   : > { %v392_v55 = vadd.f32 %v391_v53, %v389_v54 }
  0xde   : > { %v393_v56 = vrot.slane %v392_v55, 4 }
  0xe0   : > { %v394_v57 = vadd.f32 %v393_v56, %v392_v55 }
  0xe2   : > { %v395_v58 = vrot.slane %v394_v57, 2 }
  0xe4   : > { %v396_v59 = vadd.f32 %v395_v58, %v394_v57 }
  0xe6   : > { %v397_v60 = vrot.slane %v396_v59, 1 }
  0xe8   : > { %v398_v62 = vadd.f32 %v397_v60, %v396_v59 }
  0xea   : > { %v401_v63 = vadd.f32 %v400_v61, %v398_v62 }
  0xec   : > { %v496_v0 = vmul.f32 -1.442695, %v401_v63 }
  0xee   : > { %559 = vpow2.f32 %v496_v0 }
  0xf4   : > { %v560_v1 = vpop.eup %559 }
  0xf5   : > { %v405_v2 = vadd.f32 1.0, %v560_v1 }
  0xf7   : > { %561 = vrcp.f32 %v405_v2  ;;  %v417_v6 = vand.u32 2147483648, %v405_v2  ;;  %v415_v8 = vand.u32 2147483647, %v405_v2  ;;  %vm411_vm2 = vweird.f32 %v405_v2 }
  0xf9   : > { %v418_v10 = vor.u32 1.1754944e-38, %v417_v6  ;;  %vm416_vm4 = vcmp.eq.f32.partialorder %v415_v8, 8.507059e+37 }
  0xfd   : > { %v562_v3 = vpop.eup %561 }
  0xfe   : > { %v407_v4 = vmul.f32 %v562_v3, %v405_v2  ;;  %vm412_vm1 = vweird.f32 %v562_v3 }
  0xff   : > { %vm413_vm3 = vmor %vm411_vm2, %vm412_vm1 }
 0x100   : > { %v408_v5 = vsub.f32 1.0, %v407_v4 }
 0x102   : > { %v409_v7 = vmul.f32 %v562_v3, %v408_v5 }
 0x104   : > { %v410_v9 = vadd.f32 %v562_v3, %v409_v7 }
 0x106   : > { %v414_v11 = vsel %vm413_vm3, %v562_v3, %v410_v9 }
 0x107   : > { %v419_v12 = vsel %vm416_vm4, %v418_v10, %v414_v11 }
 0x108   : > { %421 = vst [vmem:[%s223_s29] sm:$0x1] %v419_v12 }
 0x109 PF: > { %s16_s20 = sadd.s32 1, %s569_s20  }
 0x10a   : > { %p13_p5 = scmp.ge.s32.totalorder %s16_s20, 5  }
 0x10c   :  { %15 = sbr.rel (!%p13_p5) target bundleno = 2 (0x2), region = 70 }

</bundles_post_ra>
